<compile_context>
chip_gen: v7x
topology: tpu7x:2x2x1
jax: 0.10.0
libtpu: 0.0.40
codegen_flags: <defaults>
</compile_context>

<pallas_src>
import functools

import jax
import jax.numpy as jnp
from jax import lax
from jax.experimental import pallas as pl
from jax.experimental.pallas import tpu as pltpu


def _read_kernel(mem_ref, q_ref, out_ref, *, use_gram):
    """One grid step.

    mem_ref : (nb, K, D)   class blocks (K = partition) or Gram matrices (K = D);
                           nb = num_blocks (resident mode) or 1 (streamed mode).
    q_ref   : (1, D, TN)   query tile in its natural q^T layout.
    out_ref : (1, nb, TN, D)
    """
    q = q_ref[0]                                    # (D, TN)
    # One XLU transpose per grid step, amortized over all blocks.  Round-trip
    # through f32 so the transpose is always a plain 32-bit transpose (the
    # identity casts are elided when q is already f32).
    qn = q.astype(jnp.float32).T.astype(q.dtype)    # (TN, D)

    nb = mem_ref.shape[0]
    for b in range(nb):                             # small; unrolled at trace time
        blk = mem_ref[b]                            # (K, D)
        if use_gram:
            # ws = q @ (mem_b^T @ mem_b); Gram precomputed once in the wrapper.
            ws = jnp.dot(qn, blk, preferred_element_type=jnp.float32)   # (TN, D)
        else:
            # score[n, p] = sum_d q[n, d] * mem_b[p, d]  == (mem_b @ q^T)^T
            score = lax.dot_general(
                qn, blk,
                dimension_numbers=(((1,), (1,)), ((), ())),
                preferred_element_type=jnp.float32)                     # (TN, K) f32
            ws = jnp.dot(score.astype(blk.dtype), blk,
                         preferred_element_type=jnp.float32)            # (TN, D) f32
        out_ref[0, b] = ws.astype(out_ref.dtype)


def _vmem_capacity_bytes():
    try:
        info = pltpu.get_tpu_info()
        for name in ("vmem_capacity_bytes", "vmem_size_bytes"):
            cap = getattr(info, name, None)
            if cap:
                return int(cap)
    except Exception:
        pass
    return 64 << 20          # conservative fallback: v7x per-TensorCore capacity


def _choose_tile_rows(n, per_row_bytes, budget_bytes):
    """Return (tile_rows, padded_n): largest 256/128-aligned tile in budget."""
    max_rows = max(int(budget_bytes // max(per_row_bytes, 1)), 1)
    if n <= max_rows:
        return n, n                                 # single tile, no padding
    for align in (256, 128):                        # MXU row tile / lane width
        tn = (max_rows // align) * align
        if tn >= align:
            return tn, -(-n // tn) * tn
    return 128, -(-n // 128) * 128                  # tiny budget; limit absorbs it


def memory_read_pallas(queries_dn, memory, num_classes, *,
                       out_dtype=jnp.float32, use_gram=None,
                       tile_rows=None, force_stream=False):
    """queries_dn: (E, D, N) queries in q^T layout; memory: (M, D).

    Returns Memory.read() stacked over E: (E, num_classes - 1, N, D).
    """
    num_e, D, N = queries_dn.shape
    M, D2 = memory.shape
    assert D == D2
    num_blocks = num_classes - 1
    # NOTE: torch.split-style ragged last block (M % (num_classes-1) != 0) is
    # not supported; we assert divisibility instead of emulating the remainder.
    assert M % num_blocks == 0, "ragged memory partition not supported"
    partition = M // num_blocks

    in_dt = queries_dn.dtype
    in_bytes = jnp.dtype(in_dt).itemsize
    out_bytes = jnp.dtype(out_dtype).itemsize

    if use_gram is None:
        # The Gram rewrite wins (~2P/D fewer MXU flops) whenever partition > D/2.
        use_gram = 2 * partition > D

    mem_blocks = memory.reshape(num_blocks, partition, D)
    if use_gram:
        op = jnp.einsum("bpi,bpj->bij",
                        mem_blocks.astype(jnp.float32),
                        mem_blocks.astype(jnp.float32)).astype(in_dt)   # (B, D, D)
        K = D
    else:
        op = mem_blocks.astype(in_dt)                                   # (B, P, D)
        K = partition

    cap = _vmem_capacity_bytes()
    target = int(cap * 0.75)
    op_bytes = num_blocks * K * D * in_bytes
    # Stream class blocks on a 3rd grid axis when the memory operand would not
    # sit comfortably resident (bites first on v7x's 64 MiB VMEM).
    stream = force_stream or ((not use_gram) and op_bytes > cap // 3)

    def _plan(mem_buffers):
        if stream:
            resident = 2 * K * D * in_bytes          # one class block, x2 buffers
            out_blocks = 1
        else:
            resident = mem_buffers * op_bytes
            out_blocks = num_blocks
        per_row = (2 * D * in_bytes                            # query tile, x2 buffers
                   + 2 * out_blocks * D * out_bytes            # output tile, x2 buffers
                   + (K + 2 * D) * 4 + (K + D) * in_bytes)     # live intermediates
        budget = max(target - resident - (2 << 20), 1 << 20)
        if tile_rows is not None:
            tn = max(8, int(tile_rows))
            tn = N if tn >= N else max(128, (tn // 128) * 128)
            n_pad = -(-N // tn) * tn
        else:
            tn, n_pad = _choose_tile_rows(N, per_row, budget)
        limit = resident + tn * per_row + (4 << 20)
        limit = int(min(max(limit, 16 << 20), int(cap * 0.92)))
        return tn, n_pad, limit

    def _run(single_buffer_memory):
        tn, n_pad, vmem_limit = _plan(1 if single_buffer_memory else 2)
        q = queries_dn
        if n_pad != N:
            q = jnp.pad(q, ((0, 0), (0, 0), (0, n_pad - N)))
        n_tiles = n_pad // tn

        if stream:
            grid = (num_e, n_tiles, num_blocks)
            mem_spec = pl.BlockSpec((1, K, D), lambda e, n, b: (b, 0, 0))
            q_spec = pl.BlockSpec((1, D, tn), lambda e, n, b: (e, 0, n))
            out_spec = pl.BlockSpec((1, 1, tn, D), lambda e, n, b: (e, b, n, 0))
            dims = ("parallel", "parallel", "arbitrary")
        else:
            grid = (num_e, n_tiles)
            if single_buffer_memory:
                # Constant index_map: a second pipeline buffer would be dead VMEM.
                mem_spec = pl.BlockSpec((num_blocks, K, D),
                                        lambda e, n: (0, 0, 0),
                                        pipeline_mode=pl.Buffered(1))
            else:
                mem_spec = pl.BlockSpec((num_blocks, K, D),
                                        lambda e, n: (0, 0, 0))
            q_spec = pl.BlockSpec((1, D, tn), lambda e, n: (e, 0, n))
            out_spec = pl.BlockSpec((1, num_blocks, tn, D),
                                    lambda e, n: (e, 0, n, 0))
            dims = ("parallel", "parallel")

        out = pl.pallas_call(
            functools.partial(_read_kernel, use_gram=use_gram),
            out_shape=jax.ShapeDtypeStruct((num_e, num_blocks, n_pad, D),
                                           out_dtype),
            grid_spec=pltpu.PrefetchScalarGridSpec(
                num_scalar_prefetch=0,
                grid=grid,
                in_specs=[mem_spec, q_spec],
                out_specs=out_spec),
            compiler_params=pltpu.CompilerParams(
                dimension_semantics=dims,
                vmem_limit_bytes=vmem_limit),
        )(op, q)
        if n_pad != N:
            out = out[:, :, :N, :]
        return out

    if stream:
        return _run(False)
    try:
        # Preferred path: memory held resident in a single VMEM buffer.
        return jax.block_until_ready(_run(True))
    except Exception:
        # pipeline_mode=pl.Buffered(1) unsupported (or ignored and the VMEM
        # limit was too tight): re-plan with a double-buffered memory operand.
        return _run(False)


def memory_forward(embeddings, keys, num_classes, *,
                   compute_dtype=jnp.float32, out_dtype=jnp.float32,
                   **read_kwargs):
    """Memory.forward, train=True, len(query)==0 branch.

    embeddings : (2, D, H, W)  source / target feature maps
    keys       : pre-stacked (M, D) memory, or a list of (1, D) slot tensors
    Returns (updated_features (2, num_blocks, N, D), memory (M, D), None).
    """
    if isinstance(keys, (list, tuple)):
        # torch.stack(keys).squeeze(1) -> (M, D).
        memory = jnp.concatenate([jnp.reshape(k, (1, -1)) for k in keys], axis=0)
    else:
        memory = keys
    num_e = embeddings.shape[0]
    D = memory.shape[1]
    # read(): query = embeddings[e].reshape(D, -1); the kernel consumes this
    # natural q^T layout directly, so there is no wrapper transpose / extra
    # HBM round trip over the queries.
    queries_dn = jnp.reshape(embeddings, (num_e, D, -1)).astype(compute_dtype)
    updated_features = memory_read_pallas(
        queries_dn, memory.astype(compute_dtype), num_classes,
        out_dtype=out_dtype, **read_kwargs)
    return updated_features, memory, None


def _reference_read(queries_nd, memory, num_classes):
    """Plain-JAX reference of Memory.read/block_compare for validation."""
    M, D = memory.shape
    partition = M // (num_classes - 1)
    outs = []
    for e in range(queries_nd.shape[0]):
        blocks = []
        for i in range(0, M, partition):
            mb = memory[i:i + partition]
            score = mb @ queries_nd[e].T
            blocks.append(score.T @ mb)
        outs.append(jnp.stack(blocks))
    return jnp.stack(outs)


if __name__ == "__main__":
    key = jax.random.PRNGKey(0)
    k1, k2, k3, k4 = jax.random.split(key, 4)

    def check(embeddings, keys, num_classes, rtol, atol, **kw):
        out, mem_arr, _ = memory_forward(embeddings, keys, num_classes, **kw)
        out = jax.block_until_ready(out)
        D = mem_arr.shape[1]
        q_nd = jnp.stack([embeddings[0].reshape(D, -1).T,
                          embeddings[1].reshape(D, -1).T])
        ref = _reference_read(q_nd, mem_arr.astype(jnp.float32), num_classes)
        assert out.shape == ref.shape, (out.shape, ref.shape)
        err = float(jnp.max(jnp.abs(out.astype(jnp.float32) - ref)))
        assert jnp.allclose(out.astype(jnp.float32), ref, rtol=rtol, atol=atol), err
        return out

    # num_classes=5 -> 4 blocks; key_dim D=32; memory_size M=32 -> partition=8.
    # (Real configs should use D as a multiple of 128 for lane-dense stores;
    #  D=32 is just a smoke-test shape.)
    emb = jax.random.normal(k1, (2, 32, 4, 4), dtype=jnp.float32)        # N = 16
    mem = jax.random.normal(k2, (32, 32), dtype=jnp.float32)

    # 1) Direct two-matmul path (partition <= D/2), f32: faithful to PyTorch.
    check(emb, mem, 5, rtol=1e-5, atol=1e-4)

    # 2) Gram-reassociated path (partition=64 > D/2): differs only by FP order.
    mem_big = jax.random.normal(k3, (128, 32), dtype=jnp.float32)
    check(emb, mem_big, 3, rtol=1e-3, atol=1e-2)

    # 3) Multi-tile + padded-N path (N=200 -> padded to 256, two 128-row tiles).
    emb_wide = jax.random.normal(k4, (2, 32, 10, 20), dtype=jnp.float32)
    check(emb_wide, mem, 5, rtol=1e-5, atol=1e-4, tile_rows=128)

    # 4) Streamed-memory fallback wiring (class blocks on a 3rd grid axis).
    check(emb, mem, 5, rtol=1e-5, atol=1e-4, force_stream=True)

    # 5) bf16 compute / f32 accumulation (halves HBM + VMEM input traffic).
    check(emb, mem, 5, rtol=2e-2, atol=5e-1, compute_dtype=jnp.bfloat16)

    # 6) bf16 output (output is the dominant HBM stream when partition is small).
    check(emb, mem, 5, rtol=2e-2, atol=5e-1, out_dtype=jnp.bfloat16)

    # 7) List-of-keys input, as in Memory.forward(train=True, len(query)==0).
    keys_list = [mem[i:i + 1] for i in range(mem.shape[0])]
    check(emb, keys_list, 5, rtol=1e-5, atol=1e-4)

    print("KERNEL_OK")
</pallas_src>

<mosaic_0001>
module attributes {stable_mosaic.version = 11 : i64} {
  func.func @_read_kernel(%arg0: i32, %arg1: i32, %arg2: memref<4x8x32xf32, #tpu.memory_space<vmem>>, %arg3: memref<1x32x16xf32, #tpu.memory_space<vmem>>, %arg4: memref<1x4x16x32xf32, #tpu.memory_space<vmem>>) attributes {dimension_semantics = [#tpu.dimension_semantics<parallel>, #tpu.dimension_semantics<parallel>], iteration_bounds = array<i64: 2, 1>, scalar_prefetch = 0 : i64, scratch_operands = 0 : i64, tpu.core_type = #tpu.core_type<tc>, window_params = [{pipeline_mode = #tpu.pipeline_mode<synchronous>, transform_indices = @transform_0, window_bounds = array<i64: 4, 8, 32>}, {transform_indices = @transform_1, window_bounds = array<i64: 1, 32, 16>}, {transform_indices = @transform_2, window_bounds = array<i64: 1, 4, 16, 32>}]} {
    %c0 = arith.constant 0 : index
    %c0_0 = arith.constant 0 : index
    %c0_1 = arith.constant 0 : index
    %0 = vector.load %arg3[%c0, %c0_0, %c0_1] : memref<1x32x16xf32, #tpu.memory_space<vmem>>, vector<1x32x16xf32>
    %1 = vector.shape_cast %0 : vector<1x32x16xf32> to vector<32x16xf32>
    %2 = tpu.transpose %1, [1, 0] : vector<32x16xf32> -> vector<16x32xf32>
    %c0_2 = arith.constant 0 : index
    %c0_3 = arith.constant 0 : index
    %c0_4 = arith.constant 0 : index
    %3 = vector.load %arg2[%c0_2, %c0_3, %c0_4] : memref<4x8x32xf32, #tpu.memory_space<vmem>>, vector<1x8x32xf32>
    %4 = vector.shape_cast %3 : vector<1x8x32xf32> to vector<8x32xf32>
    %cst = arith.constant dense<0.000000e+00> : vector<16x8xf32>
    %5 = tpu.matmul %2, %4, %cst {dimension_numbers = #tpu.dot_dimension_numbers<[1], [1], [0], [0], [0, 0, 1, 0], [], []>} : vector<16x32xf32>, vector<8x32xf32>, vector<16x8xf32> -> vector<16x8xf32>
    %cst_5 = arith.constant dense<0.000000e+00> : vector<16x32xf32>
    %6 = tpu.matmul %5, %4, %cst_5 {dimension_numbers = #tpu.dot_dimension_numbers<[1], [0], [0], [1], [0, 0, 1, 1], [], []>} : vector<16x8xf32>, vector<8x32xf32>, vector<16x32xf32> -> vector<16x32xf32>
    %c0_6 = arith.constant 0 : index
    %c0_7 = arith.constant 0 : index
    %c0_8 = arith.constant 0 : index
    %c0_9 = arith.constant 0 : index
    %7 = vector.load %arg4[%c0_6, %c0_7, %c0_8, %c0_9] : memref<1x4x16x32xf32, #tpu.memory_space<vmem>>, vector<1x1x16x32xf32>
    %8 = vector.shape_cast %7 : vector<1x1x16x32xf32> to vector<16x32xf32>
    %9 = vector.shape_cast %6 : vector<16x32xf32> to vector<1x1x16x32xf32>
    tpu.vector_store %arg4[%c0_6, %c0_7, %c0_8, %c0_9], %9 {strides = array<i32>} : memref<1x4x16x32xf32, #tpu.memory_space<vmem>>, vector<1x1x16x32xf32>,
    %c1 = arith.constant 1 : index
    %c0_10 = arith.constant 0 : index
    %c0_11 = arith.constant 0 : index
    %10 = vector.load %arg2[%c1, %c0_10, %c0_11] : memref<4x8x32xf32, #tpu.memory_space<vmem>>, vector<1x8x32xf32>
    %11 = vector.shape_cast %10 : vector<1x8x32xf32> to vector<8x32xf32>
    %cst_12 = arith.constant dense<0.000000e+00> : vector<16x8xf32>
    %12 = tpu.matmul %2, %11, %cst_12 {dimension_numbers = #tpu.dot_dimension_numbers<[1], [1], [0], [0], [0, 0, 1, 0], [], []>} : vector<16x32xf32>, vector<8x32xf32>, vector<16x8xf32> -> vector<16x8xf32>
    %cst_13 = arith.constant dense<0.000000e+00> : vector<16x32xf32>
    %13 = tpu.matmul %12, %11, %cst_13 {dimension_numbers = #tpu.dot_dimension_numbers<[1], [0], [0], [1], [0, 0, 1, 1], [], []>} : vector<16x8xf32>, vector<8x32xf32>, vector<16x32xf32> -> vector<16x32xf32>
    %c0_14 = arith.constant 0 : index
    %c1_15 = arith.constant 1 : index
    %c0_16 = arith.constant 0 : index
    %c0_17 = arith.constant 0 : index
    %14 = vector.load %arg4[%c0_14, %c1_15, %c0_16, %c0_17] : memref<1x4x16x32xf32, #tpu.memory_space<vmem>>, vector<1x1x16x32xf32>
    %15 = vector.shape_cast %14 : vector<1x1x16x32xf32> to vector<16x32xf32>
    %16 = vector.shape_cast %13 : vector<16x32xf32> to vector<1x1x16x32xf32>
    tpu.vector_store %arg4[%c0_14, %c1_15, %c0_16, %c0_17], %16 {strides = array<i32>} : memref<1x4x16x32xf32, #tpu.memory_space<vmem>>, vector<1x1x16x32xf32>,
    %c2 = arith.constant 2 : index
    %c0_18 = arith.constant 0 : index
    %c0_19 = arith.constant 0 : index
    %17 = vector.load %arg2[%c2, %c0_18, %c0_19] : memref<4x8x32xf32, #tpu.memory_space<vmem>>, vector<1x8x32xf32>
    %18 = vector.shape_cast %17 : vector<1x8x32xf32> to vector<8x32xf32>
    %cst_20 = arith.constant dense<0.000000e+00> : vector<16x8xf32>
    %19 = tpu.matmul %2, %18, %cst_20 {dimension_numbers = #tpu.dot_dimension_numbers<[1], [1], [0], [0], [0, 0, 1, 0], [], []>} : vector<16x32xf32>, vector<8x32xf32>, vector<16x8xf32> -> vector<16x8xf32>
    %cst_21 = arith.constant dense<0.000000e+00> : vector<16x32xf32>
    %20 = tpu.matmul %19, %18, %cst_21 {dimension_numbers = #tpu.dot_dimension_numbers<[1], [0], [0], [1], [0, 0, 1, 1], [], []>} : vector<16x8xf32>, vector<8x32xf32>, vector<16x32xf32> -> vector<16x32xf32>
    %c0_22 = arith.constant 0 : index
    %c2_23 = arith.constant 2 : index
    %c0_24 = arith.constant 0 : index
    %c0_25 = arith.constant 0 : index
    %21 = vector.load %arg4[%c0_22, %c2_23, %c0_24, %c0_25] : memref<1x4x16x32xf32, #tpu.memory_space<vmem>>, vector<1x1x16x32xf32>
    %22 = vector.shape_cast %21 : vector<1x1x16x32xf32> to vector<16x32xf32>
    %23 = vector.shape_cast %20 : vector<16x32xf32> to vector<1x1x16x32xf32>
    tpu.vector_store %arg4[%c0_22, %c2_23, %c0_24, %c0_25], %23 {strides = array<i32>} : memref<1x4x16x32xf32, #tpu.memory_space<vmem>>, vector<1x1x16x32xf32>,
    %c3 = arith.constant 3 : index
    %c0_26 = arith.constant 0 : index
    %c0_27 = arith.constant 0 : index
    %24 = vector.load %arg2[%c3, %c0_26, %c0_27] : memref<4x8x32xf32, #tpu.memory_space<vmem>>, vector<1x8x32xf32>
    %25 = vector.shape_cast %24 : vector<1x8x32xf32> to vector<8x32xf32>
    %cst_28 = arith.constant dense<0.000000e+00> : vector<16x8xf32>
    %26 = tpu.matmul %2, %25, %cst_28 {dimension_numbers = #tpu.dot_dimension_numbers<[1], [1], [0], [0], [0, 0, 1, 0], [], []>} : vector<16x32xf32>, vector<8x32xf32>, vector<16x8xf32> -> vector<16x8xf32>
    %cst_29 = arith.constant dense<0.000000e+00> : vector<16x32xf32>
    %27 = tpu.matmul %26, %25, %cst_29 {dimension_numbers = #tpu.dot_dimension_numbers<[1], [0], [0], [1], [0, 0, 1, 1], [], []>} : vector<16x8xf32>, vector<8x32xf32>, vector<16x32xf32> -> vector<16x32xf32>
    %c0_30 = arith.constant 0 : index
    %c3_31 = arith.constant 3 : index
    %c0_32 = arith.constant 0 : index
    %c0_33 = arith.constant 0 : index
    %28 = vector.load %arg4[%c0_30, %c3_31, %c0_32, %c0_33] : memref<1x4x16x32xf32, #tpu.memory_space<vmem>>, vector<1x1x16x32xf32>
    %29 = vector.shape_cast %28 : vector<1x1x16x32xf32> to vector<16x32xf32>
    %30 = vector.shape_cast %27 : vector<16x32xf32> to vector<1x1x16x32xf32>
    tpu.vector_store %arg4[%c0_30, %c3_31, %c0_32, %c0_33], %30 {strides = array<i32>} : memref<1x4x16x32xf32, #tpu.memory_space<vmem>>, vector<1x1x16x32xf32>,
    return
  }
  func.func @transform_0(%arg0: i32, %arg1: i32) -> (i32, i32, i32) {
    %c0_i32 = arith.constant 0 : i32
    %c0_i32_0 = arith.constant 0 : i32
    %c0_i32_1 = arith.constant 0 : i32
    %c0_i32_2 = arith.constant 0 : i32
    return %c0_i32, %c0_i32_0, %c0_i32_1 : i32, i32, i32
  }
  func.func @transform_1(%arg0: i32, %arg1: i32) -> (i32, i32, i32) {
    %c0_i32 = arith.constant 0 : i32
    %c0_i32_0 = arith.constant 0 : i32
    return %arg0, %c0_i32, %arg1 : i32, i32, i32
  }
  func.func @transform_2(%arg0: i32, %arg1: i32) -> (i32, i32, i32, i32) {
    %c0_i32 = arith.constant 0 : i32
    %c0_i32_0 = arith.constant 0 : i32
    %c0_i32_1 = arith.constant 0 : i32
    return %arg0, %c0_i32, %arg1, %c0_i32_0 : i32, i32, i32, i32
  }
}

module attributes {stable_mosaic.version = 11 : i64} {
  func.func @_read_kernel(%arg0: i32, %arg1: i32, %arg2: memref<4x8x32xf32, #tpu.memory_space<vmem>>, %arg3: memref<1x32x16xf32, #tpu.memory_space<vmem>>, %arg4: memref<1x4x16x32xf32, #tpu.memory_space<vmem>>) attributes {dimension_semantics = [#tpu.dimension_semantics<parallel>, #tpu.dimension_semantics<parallel>], iteration_bounds = array<i64: 2, 1>, scalar_prefetch = 0 : i64, scratch_operands = 0 : i64, tpu.core_type = #tpu.core_type<tc>, window_params = [{pipeline_mode = #tpu.pipeline_mode<synchronous>, transform_indices = @transform_0, window_bounds = array<i64: 4, 8, 32>}, {transform_indices = @transform_1, window_bounds = array<i64: 1, 32, 16>}, {transform_indices = @transform_2, window_bounds = array<i64: 1, 4, 16, 32>}]} {
    %c0 = arith.constant 0 : index
    %c0_0 = arith.constant 0 : index
    %c0_1 = arith.constant 0 : index
    %0 = vector.load %arg3[%c0, %c0_0, %c0_1] : memref<1x32x16xf32, #tpu.memory_space<vmem>>, vector<1x32x16xf32>
    %1 = vector.shape_cast %0 : vector<1x32x16xf32> to vector<32x16xf32>
    %2 = tpu.transpose %1, [1, 0] : vector<32x16xf32> -> vector<16x32xf32>
    %c0_2 = arith.constant 0 : index
    %c0_3 = arith.constant 0 : index
    %c0_4 = arith.constant 0 : index
    %3 = vector.load %arg2[%c0_2, %c0_3, %c0_4] : memref<4x8x32xf32, #tpu.memory_space<vmem>>, vector<1x8x32xf32>
    %4 = vector.shape_cast %3 : vector<1x8x32xf32> to vector<8x32xf32>
    %cst = arith.constant dense<0.000000e+00> : vector<16x8xf32>
    %5 = tpu.matmul %2, %4, %cst {dimension_numbers = #tpu.dot_dimension_numbers<[1], [1], [0], [0], [0, 0, 1, 0], [], []>} : vector<16x32xf32>, vector<8x32xf32>, vector<16x8xf32> -> vector<16x8xf32>
    %cst_5 = arith.constant dense<0.000000e+00> : vector<16x32xf32>
    %6 = tpu.matmul %5, %4, %cst_5 {dimension_numbers = #tpu.dot_dimension_numbers<[1], [0], [0], [1], [0, 0, 1, 1], [], []>} : vector<16x8xf32>, vector<8x32xf32>, vector<16x32xf32> -> vector<16x32xf32>
    %c0_6 = arith.constant 0 : index
    %c0_7 = arith.constant 0 : index
    %c0_8 = arith.constant 0 : index
    %c0_9 = arith.constant 0 : index
    %7 = vector.load %arg4[%c0_6, %c0_7, %c0_8, %c0_9] : memref<1x4x16x32xf32, #tpu.memory_space<vmem>>, vector<1x1x16x32xf32>
    %8 = vector.shape_cast %7 : vector<1x1x16x32xf32> to vector<16x32xf32>
    %9 = vector.shape_cast %6 : vector<16x32xf32> to vector<1x1x16x32xf32>
    tpu.vector_store %arg4[%c0_6, %c0_7, %c0_8, %c0_9], %9 {strides = array<i32>} : memref<1x4x16x32xf32, #tpu.memory_space<vmem>>, vector<1x1x16x32xf32>,
    %c1 = arith.constant 1 : index
    %c0_10 = arith.constant 0 : index
    %c0_11 = arith.constant 0 : index
    %10 = vector.load %arg2[%c1, %c0_10, %c0_11] : memref<4x8x32xf32, #tpu.memory_space<vmem>>, vector<1x8x32xf32>
    %11 = vector.shape_cast %10 : vector<1x8x32xf32> to vector<8x32xf32>
    %cst_12 = arith.constant dense<0.000000e+00> : vector<16x8xf32>
    %12 = tpu.matmul %2, %11, %cst_12 {dimension_numbers = #tpu.dot_dimension_numbers<[1], [1], [0], [0], [0, 0, 1, 0], [], []>} : vector<16x32xf32>, vector<8x32xf32>, vector<16x8xf32> -> vector<16x8xf32>
    %cst_13 = arith.constant dense<0.000000e+00> : vector<16x32xf32>
    %13 = tpu.matmul %12, %11, %cst_13 {dimension_numbers = #tpu.dot_dimension_numbers<[1], [0], [0], [1], [0, 0, 1, 1], [], []>} : vector<16x8xf32>, vector<8x32xf32>, vector<16x32xf32> -> vector<16x32xf32>
    %c0_14 = arith.constant 0 : index
    %c1_15 = arith.constant 1 : index
    %c0_16 = arith.constant 0 : index
    %c0_17 = arith.constant 0 : index
    %14 = vector.load %arg4[%c0_14, %c1_15, %c0_16, %c0_17] : memref<1x4x16x32xf32, #tpu.memory_space<vmem>>, vector<1x1x16x32xf32>
    %15 = vector.shape_cast %14 : vector<1x1x16x32xf32> to vector<16x32xf32>
    %16 = vector.shape_cast %13 : vector<16x32xf32> to vector<1x1x16x32xf32>
    tpu.vector_store %arg4[%c0_14, %c1_15, %c0_16, %c0_17], %16 {strides = array<i32>} : memref<1x4x16x32xf32, #tpu.memory_space<vmem>>, vector<1x1x16x32xf32>,
    %c2 = arith.constant 2 : index
    %c0_18 = arith.constant 0 : index
    %c0_19 = arith.constant 0 : index
    %17 = vector.load %arg2[%c2, %c0_18, %c0_19] : memref<4x8x32xf32, #tpu.memory_space<vmem>>, vector<1x8x32xf32>
    %18 = vector.shape_cast %17 : vector<1x8x32xf32> to vector<8x32xf32>
    %cst_20 = arith.constant dense<0.000000e+00> : vector<16x8xf32>
    %19 = tpu.matmul %2, %18, %cst_20 {dimension_numbers = #tpu.dot_dimension_numbers<[1], [1], [0], [0], [0, 0, 1, 0], [], []>} : vector<16x32xf32>, vector<8x32xf32>, vector<16x8xf32> -> vector<16x8xf32>
    %cst_21 = arith.constant dense<0.000000e+00> : vector<16x32xf32>
    %20 = tpu.matmul %19, %18, %cst_21 {dimension_numbers = #tpu.dot_dimension_numbers<[1], [0], [0], [1], [0, 0, 1, 1], [], []>} : vector<16x8xf32>, vector<8x32xf32>, vector<16x32xf32> -> vector<16x32xf32>
    %c0_22 = arith.constant 0 : index
    %c2_23 = arith.constant 2 : index
    %c0_24 = arith.constant 0 : index
    %c0_25 = arith.constant 0 : index
    %21 = vector.load %arg4[%c0_22, %c2_23, %c0_24, %c0_25] : memref<1x4x16x32xf32, #tpu.memory_space<vmem>>, vector<1x1x16x32xf32>
    %22 = vector.shape_cast %21 : vector<1x1x16x32xf32> to vector<16x32xf32>
    %23 = vector.shape_cast %20 : vector<16x32xf32> to vector<1x1x16x32xf32>
    tpu.vector_store %arg4[%c0_22, %c2_23, %c0_24, %c0_25], %23 {strides = array<i32>} : memref<1x4x16x32xf32, #tpu.memory_space<vmem>>, vector<1x1x16x32xf32>,
    %c3 = arith.constant 3 : index
    %c0_26 = arith.constant 0 : index
    %c0_27 = arith.constant 0 : index
    %24 = vector.load %arg2[%c3, %c0_26, %c0_27] : memref<4x8x32xf32, #tpu.memory_space<vmem>>, vector<1x8x32xf32>
    %25 = vector.shape_cast %24 : vector<1x8x32xf32> to vector<8x32xf32>
    %cst_28 = arith.constant dense<0.000000e+00> : vector<16x8xf32>
    %26 = tpu.matmul %2, %25, %cst_28 {dimension_numbers = #tpu.dot_dimension_numbers<[1], [1], [0], [0], [0, 0, 1, 0], [], []>} : vector<16x32xf32>, vector<8x32xf32>, vector<16x8xf32> -> vector<16x8xf32>
    %cst_29 = arith.constant dense<0.000000e+00> : vector<16x32xf32>
    %27 = tpu.matmul %26, %25, %cst_29 {dimension_numbers = #tpu.dot_dimension_numbers<[1], [0], [0], [1], [0, 0, 1, 1], [], []>} : vector<16x8xf32>, vector<8x32xf32>, vector<16x32xf32> -> vector<16x32xf32>
    %c0_30 = arith.constant 0 : index
    %c3_31 = arith.constant 3 : index
    %c0_32 = arith.constant 0 : index
    %c0_33 = arith.constant 0 : index
    %28 = vector.load %arg4[%c0_30, %c3_31, %c0_32, %c0_33] : memref<1x4x16x32xf32, #tpu.memory_space<vmem>>, vector<1x1x16x32xf32>
    %29 = vector.shape_cast %28 : vector<1x1x16x32xf32> to vector<16x32xf32>
    %30 = vector.shape_cast %27 : vector<16x32xf32> to vector<1x1x16x32xf32>
    tpu.vector_store %arg4[%c0_30, %c3_31, %c0_32, %c0_33], %30 {strides = array<i32>} : memref<1x4x16x32xf32, #tpu.memory_space<vmem>>, vector<1x1x16x32xf32>,
    return
  }
  func.func @transform_0(%arg0: i32, %arg1: i32) -> (i32, i32, i32) {
    %c0_i32 = arith.constant 0 : i32
    %c0_i32_0 = arith.constant 0 : i32
    %c0_i32_1 = arith.constant 0 : i32
    %c0_i32_2 = arith.constant 0 : i32
    return %c0_i32, %c0_i32_0, %c0_i32_1 : i32, i32, i32
  }
  func.func @transform_1(%arg0: i32, %arg1: i32) -> (i32, i32, i32) {
    %c0_i32 = arith.constant 0 : i32
    %c0_i32_0 = arith.constant 0 : i32
    return %arg0, %c0_i32, %arg1 : i32, i32, i32
  }
  func.func @transform_2(%arg0: i32, %arg1: i32) -> (i32, i32, i32, i32) {
    %c0_i32 = arith.constant 0 : i32
    %c0_i32_0 = arith.constant 0 : i32
    %c0_i32_1 = arith.constant 0 : i32
    return %arg0, %c0_i32, %arg1, %c0_i32_0 : i32, i32, i32, i32
  }
}

</mosaic_0001>

<bundles_post_ra>
// kernel: tpu_custom_call.1
= control target key start
LH: loop header
LB: loop body
LE: loop exit
PB: predicated region body
PF: predicated region fallthrough
CT: control target
= control target key end

     0   :  { %7 = vsyncpa [#allocation3], 0  ;;  %s1399_s0 = inlined_call_operand.vmem [shape: f32[4,8,32], index: 0, kind: input, shape index: {}]   ;;  %s1400_s1 = inlined_call_operand.vmem [shape: f32[2,32,16], index: 1, kind: input, shape index: {}]   ;;  %s1401_s2 = inlined_call_operand.hbm [shape: f32[2,4,16,32], index: 2, kind: output, shape index: {}]  }
   0x1   :  { %9 = vsyncpa [#allocation3 + $0x1], 0  ;;  %s1225_s9 = smov 0   ;;  %s1227_s10 = smov 0  }
   0x2   :  { %s1229_s11 = smov 0   ;;  %s1231_s12 = smov 0  }
   0x3   :  { %s1233_s13 = smov 0   ;;  %s1235_s14 = smov 0  }
   0x4 LB: > { %s961_s15 = sadd.s32 4294967295, %s1205_s14   ;;  %s962_s16 = sadd.s32 4294967294, %s1205_s14   ;;  %s1205_s14 = sphi %s1235_s14, %s15_s14   ;;  %s1201_s13 = sphi %s1233_s13, %s1408_s13   ;;  %s1197_s12 = sphi %s1231_s12, %s1407_s12   ;;  %s1193_s11 = sphi %s1229_s11, %s1406_s11   ;;  %s1189_s10 = sphi %s1227_s10, %s1405_s10   ;;  %s1185_s9 = sphi %s1225_s9, %s1404_s9  }
   0x5   : > { %s27_s17 = sadd.s32 1, %s1201_s13  ;;  %s85_s18 = sadd.s32 1, %s1193_s11 }
   0x6   : > { %p29_p0 = scmp.ge.s32.totalorder %s27_s17, 2  ;;  %p95_p1 = scmp.ne.s32.totalorder %s1193_s11, %s1189_s10 }
   0x7   : > { %p96_p2 = scmp.eq.s32.totalorder %s961_s15, 1  ;;  %p101_p3 = scmp.ne.s32.totalorder %s1189_s10, %s1185_s9 }
   0x8   : > { %s1410_s17 = smov (%p29_p0, %s27_s17), 0  ;;  %p102_p5 = scmp.eq.s32.totalorder %s962_s16, 1 }
   0x9   : > { %p1265_p4 = por %p96_p2, %p95_p1  ;;  %s80_s20 = ssub.s32 %s1201_s13, %s1410_s17 }
   0xa   : > { %p965_p6 = scmp.ge.s32.totalorder %s1205_s14, 1  ;;  %p83_p7 = scmp.eq.s32.totalorder %s80_s20, 0 }
   0xb   : > { %p1272_p8 = por %p102_p5, %p101_p3  ;;  %p134_p9 = scmp.lt.s32.totalorder %s1205_s14, 3 }
   0xc   : > { %s1278_s22 = scalar_select %p83_p7, %s1193_s11, %s85_s18  }
   0xd   : > { %p135_p10 = pnand %p965_p6, %p134_p9 }
   0xe   : > { %p159_p11 = scmp.lt.s32.totalorder (!%p135_p10), %s1197_s12, 1  ;;  %v204_v1 = vld [vmem:[%s1399_s0] sm:$0xff] (!%p135_p10)  ;;  %vm205_vm0 = vcmask (!%p135_p10), 261120   ;;  %v974_v7 = vld [vmem:[%s1399_s0 + $0x8] sm:$0xff] (!%p135_p10)  ;;  %v982_v8 = vld [vmem:[%s1399_s0 + $0x10] sm:$0xff] (!%p135_p10)  ;;  %vm290_vm1 = vcmask (!%p135_p10), 64512  }
   0xf   : > { %138 = sbr.rel (%p135_p10) target bundleno = 828 (0x33c), region = 28  ;;  %1029 = vmatprep.subr.msk.mxu0 (!%p135_p10), %vm205_vm0, %v204_v1  ;;  %1034 = vmatprep.subr.mxu1 (!%p135_p10), %v204_v1  ;;  %v990_v11 = vld [vmem:[%s1399_s0 + $0x18] sm:$0xff] (!%p135_p10)  ;;  %s156_s8 = sand.u32 (!%p135_p10), 1, %s1189_s10  }
  0x10   : > { %1030 = vmatpush3.xpose.msk.msra.mxu0 (!%p135_p10), %vm205_vm0, %v204_v1  ;;  %1035 = vmatpush3.msra.mxu1 (!%p135_p10), %v204_v1  ;;  %s966_s15 = sshll.u32 (!%p135_p10), %s156_s8, 6  ;;  %s1004_s18 = sshll.u32 (!%p135_p10), %s1197_s12, 10 }
  0x11   : > { %1039 = vmatprep.subr.msk.mxu1 (!%p135_p10), %vm205_vm0, %v974_v7  ;;  %1044 = vmatprep.subr.mxu0 (!%p135_p10), %v974_v7  ;;  %s1318_s16 = scalar_lea.vmem (!%p135_p10), [#allocation2], %s966_s15  ;;  %s1343_s25 = scalar_lea.hbm (!%p135_p10), %s1401_s2, %s1004_s18 }
  0x12   : > { %s882_s20 = sshll.u32 (!%p135_p10), %s1318_s16, 4  ;;  %s1345_s20 = int_to_ptr.vmem [resolvable:$true] %s882_s20 }
  0x13   : > { %s1127_s26 = scalar_lea.vmem (!%p135_p10), %s1345_s20, 1024 }
  0x14   : > { %p1128_p12 = scmp.ne.s32.totalorder (!%p135_p10), %s1345_s20, %s1127_s26 }
  0x16   : > { %s160_s23 = scalar_select %p159_p11, %s1197_s12, 1 }
  0x17   : > { %s1353_s12 = scalar_lea.sflag [#allocation3], %s156_s8  ;;  %p1129_p13 = pnand %p1128_p12, %p1265_p4 }
  0x18   : > { %s1003_s24 = sshll.u32 %s160_s23, 5 }
  0x19   : > { %s166_s27 = scalar_lea.vmem %s1400_s1, %s1003_s24  ;;  %p1130_p0 = pneg %p1129_p13 }
  0x1a   : > { %v168_v0 = vld [vmem:[%s166_s27] sm:$0xff]  ;;  %v169_v2 = vld [vmem:[%s166_s27 + $0x8] sm:$0xff]  ;;  %v170_v3 = vld [vmem:[%s166_s27 + $0x10] sm:$0xff] }
  0x1b   : > { %172 = vxpose.xlu0.b32.start [1/4] (short) (narrow) %v168_v0, 16  ;;  %v171_v4 = vld [vmem:[%s166_s27 + $0x18] sm:$0xff]  ;;  %s1207_s27 = smov [#allocation2]  }
  0x1c   : > { %s1131_s28 = sshll.u32 %s1207_s27, 4  ;;  %s1132_s28 = int_to_ptr.vmem [resolvable:$false] %s1131_s28 }
  0x1d   : > { %s1133_s29 = scalar_lea.vmem %s1132_s28, 2048  ;;  %p1134_p1 = scmp.lt.s32.totalorder %s1345_s20, %s1132_s28 }
  0x1e   : > { %p1135_p2 = scmp.lt.s32.totalorder %s1133_s29, %s1127_s26 }
  0x1f   : > { %173 = vxpose.xlu0.b32.cont [2/4] (short) (narrow) %v169_v2, 16 }
  0x20   : > { %p1136_p3 = por %p1135_p2, %p1134_p1 }
  0x22   : > { %p1137_p5 = pnand %p1136_p3, %p1130_p0 }
  0x23   : > { %174 = vxpose.xlu0.b32.cont [3/4] (short) (narrow) %v170_v3, 16 }
  0x27   : > { %175 = vxpose.xlu0.b32.end [4/4] (short) (narrow) %v171_v4, 16 }
  0x9b   : > { %v188_v5 = vpop.trf.xlu0 }
  0x9c   : > { %1031 = vmatprep.mubr.msk.f32.mxu0 %vm205_vm0, %v188_v5 }
  0x9f   : > { %v189_v6 = vpop.trf.xlu0 }
  0xa0   : > { %1032 = vmatmul.mubr.msk.f32.vlgmr.msra.gmra.mrb[0].mxu0 %vm205_vm0, %v189_v6 }
  0xa1   : > { %1045 = vmatpush3.msra.mxu0 %v974_v7 }
  0xa2   : > { %1054 = vmatprep.subr.mxu0 %v982_v8 }
 0x173   : > { %v1033_v9 = vpop.f32.mrb[0].mxu0 }
 0x174   : > { %v281_v10 = vpop.f32.mrb[1].mxu0 }
 0x175   : > { %1036 = vmatprep.mubr.msk.f32.mxu1 %vm290_vm1, %v281_v10 }
 0x176   : > { %1037 = vmatmul.mubr.msk.f32.vlgmr.msra.gmra.mrb[0].mxu1 %vm290_vm1, %v1033_v9 }
 0x177   : > { %1040 = vmatpush3.xpose.msk.msra.mxu1 %vm205_vm0, %v974_v7  ;;  %1041 = vmatprep.mubr.msk.f32.mxu1 %vm205_vm0, %v188_v5 }
 0x178   : > { %1049 = vmatprep.subr.msk.mxu1 %vm205_vm0, %v982_v8 }
 0x17a   : > { %1042 = vmatmul.mubr.msk.f32.vlgmr.msra.gmra.mrb[2].mxu1 %vm205_vm0, %v189_v6 }
 0x17b   : > { %1050 = vmatpush3.xpose.msk.msra.mxu1 %vm205_vm0, %v982_v8  ;;  %1051 = vmatprep.mubr.msk.f32.mxu1 %vm205_vm0, %v188_v5 }
 0x17c   : > { %1059 = vmatprep.subr.msk.mxu1 %vm205_vm0, %v990_v11 }
 0x17e   : > { %1052 = vmatmul.mubr.msk.f32.vlgmr.msra.gmra.mrb[4].mxu1 %vm205_vm0, %v189_v6 }
 0x17f   : > { %1060 = vmatpush3.xpose.msk.msra.mxu1 %vm205_vm0, %v990_v11  ;;  %1061 = vmatprep.mubr.msk.f32.mxu1 %vm205_vm0, %v188_v5 }
 0x182   : > { %1062 = vmatmul.mubr.msk.f32.vlgmr.msra.gmra.mrb[6].mxu1 %vm205_vm0, %v189_v6 }
 0x249   : > { %v1038_v12 = vpop.f32.mrb[0].mxu1 }
 0x24a   : > { %373 = vst.msk [vmem:[%s1318_s16 + $0x8] sm:$0xff] %vm205_vm0, %v1038_v12  ;;  %v363_v13 = vpop.f32.mrb[1].mxu1 }
 0x24b   : > { %372 = vst.msk [vmem:[%s1318_s16] sm:$0xff] %vm205_vm0, %v363_v13 }
 0x24d   : > { %v1043_v14 = vpop.f32.mrb[2].mxu1 }
 0x24e   : > { %v445_v15 = vpop.f32.mrb[3].mxu1 }
 0x24f   : > { %1046 = vmatprep.mubr.msk.f32.mxu0 %vm290_vm1, %v445_v15 }
 0x250   : > { %1047 = vmatmul.mubr.msk.f32.vlgmr.msra.gmra.mrb[2].mxu0 %vm290_vm1, %v1043_v14 }
 0x251   : > { %1055 = vmatpush3.msra.mxu0 %v982_v8  ;;  %v1053_v16 = vpop.f32.mrb[4].mxu1 }
 0x252   : > { %v609_v17 = vpop.f32.mrb[5].mxu1  ;;  %1064 = vmatprep.subr.mxu0 %v990_v11 }
 0x253   : > { %1056 = vmatprep.mubr.msk.f32.mxu0 %vm290_vm1, %v609_v17 }
 0x254   : > { %1057 = vmatmul.mubr.msk.f32.vlgmr.msra.gmra.mrb[4].mxu0 %vm290_vm1, %v1053_v16 }
 0x255   : > { %1065 = vmatpush3.msra.mxu0 %v990_v11  ;;  %v1063_v18 = vpop.f32.mrb[6].mxu1 }
 0x256   : > { %v773_v19 = vpop.f32.mrb[7].mxu1 }
 0x257   : > { %1066 = vmatprep.mubr.msk.f32.mxu0 %vm290_vm1, %v773_v19 }
 0x258   : > { %1067 = vmatmul.mubr.msk.f32.vlgmr.msra.gmra.mrb[6].mxu0 %vm290_vm1, %v1063_v18 }
 0x323   : > { %v1048_v20 = vpop.f32.mrb[2].mxu0 }
 0x324   : > { %981 = vst.msk [vmem:[%s1318_s16 + $0x18] sm:$0xff] %vm205_vm0, %v1048_v20  ;;  %v526_v21 = vpop.f32.mrb[3].mxu0 }
 0x325   : > { %980 = vst.msk [vmem:[%s1318_s16 + $0x10] sm:$0xff] %vm205_vm0, %v526_v21 }
 0x327   : > { %v1058_v22 = vpop.f32.mrb[4].mxu0 }
 0x328   : > { %989 = vst.msk [vmem:[%s1318_s16 + $0x28] sm:$0xff] %vm205_vm0, %v1058_v22  ;;  %v690_v23 = vpop.f32.mrb[5].mxu0 }
 0x329   : > { %988 = vst.msk [vmem:[%s1318_s16 + $0x20] sm:$0xff] %vm205_vm0, %v690_v23 }
 0x32b   : > { %v1068_v24 = vpop.f32.mrb[6].mxu0 }
 0x32c   : > { %997 = vst.msk [vmem:[%s1318_s16 + $0x38] sm:$0xff] %vm205_vm0, %v1068_v24  ;;  %v854_v25 = vpop.f32.mrb[7].mxu0 }
 0x32d   : > { %996 = vst.msk [vmem:[%s1318_s16 + $0x30] sm:$0xff] %vm205_vm0, %v854_v25 }
 0x32e   : > { %1140 = shalt.err (!%p1137_p5)
}
 0x32f   : > { %s1141_s30 = scalar_lea.hbm %s1343_s25, 1024  ;;  %s1145_s5 = scalar_lea.hbm %s1401_s2, 2048 }
 0x330   : > { %p1142_p6 = scmp.ne.s32.totalorder %s1343_s25, %s1141_s30  ;;  %p1146_p10 = scmp.lt.u32.totalorder %s1343_s25, %s1401_s2 }
 0x331   : > { %p1147_p11 = scmp.lt.u32.totalorder %s1145_s5, %s1141_s30  ;;  %p1149_p13 = scmp.lt.u32.totalorder %s1141_s30, %s1343_s25 }
 0x332   : > { %p1143_p7 = pnand %p1142_p6, %p1265_p4 }
 0x333   : > { %p1148_p12 = por %p1147_p11, %p1146_p10 }
 0x334   : > { %p1144_p9 = pneg %p1143_p7 }
 0x335   : > { %p1150_p0 = por %p1149_p13, %p1148_p12 }
 0x337   : > { %p1151_p1 = pnand %p1150_p0, %p1144_p9 }
 0x339   : > { %1154 = shalt.err (!%p1151_p1)
}
 0x33a   : > { %s1208_s8 = smov 128   ;;  %s1209_s15 = smov 8  }
 0x33b   : > { %1069 = dma.vmem_to_hbm [thread:$0]  (%p1265_p4), %s1345_s20, 1024, %s1343_s25, %s1353_s12, %s1208_s8, %s1208_s8, %s1209_s15  }
 0x33c PF: > { %p1075_p2 = scmp.ge.s32.totalorder %s1205_s14, 2  ;;  %s897_s16 = sand.u32 1, %s1185_s9  }
 0x33d   : > { %s898_s18 = scalar_lea.sflag [#allocation3], %s897_s16 }
 0x33e   : > { %p1072_p3 = pnand %p1075_p2, %p1272_p8 }
 0x340   : > { %1180 = dma.done.wait (!%p1072_p3), %s898_s18, 1024  }
 0x341   : > { %1182 = vsyncadd (!%p1072_p3), %s898_s18, 4294966272  ;;  %s15_s14 = sadd.s32 1, %s1205_s14   ;;  %s1404_s9 = smov %s1189_s10 }
 0x342   : > { %p12_p5 = scmp.ge.s32.totalorder %s15_s14, 4   ;;  %s1405_s10 = smov %s1193_s11 }
 0x343   : > { %s1406_s11 = smov %s1278_s22  ;;  %s1407_s12 = smov %s1201_s13 }
 0x344   : > { %s1408_s13 = smov %s1410_s17  ;;  %14 = sbr.rel (!%p12_p5) target bundleno = 4 (0x4), region = 69 }
 0x34b   :  { %903 = vsyncpa [#allocation3], 1 }
 0x34c   :  { %905 = vsyncpa [#allocation3 + $0x1], 1 }

// kernel: tpu_custom_call.1
= control target key start
LH: loop header
LB: loop body
LE: loop exit
PB: predicated region body
PF: predicated region fallthrough
CT: control target
= control target key end

     0   :  { %7 = vsyncpa [#allocation3], 0  ;;  %s1399_s0 = inlined_call_operand.vmem [shape: f32[4,8,32], index: 0, kind: input, shape index: {}]   ;;  %s1400_s1 = inlined_call_operand.vmem [shape: f32[2,32,16], index: 1, kind: input, shape index: {}]   ;;  %s1401_s2 = inlined_call_operand.hbm [shape: f32[2,4,16,32], index: 2, kind: output, shape index: {}]  }
   0x1   :  { %9 = vsyncpa [#allocation3 + $0x1], 0  ;;  %s1225_s9 = smov 0   ;;  %s1227_s10 = smov 0  }
   0x2   :  { %s1229_s11 = smov 0   ;;  %s1231_s12 = smov 0  }
   0x3   :  { %s1233_s13 = smov 0   ;;  %s1235_s14 = smov 0  }
   0x4 LB: > { %s961_s15 = sadd.s32 4294967295, %s1205_s14   ;;  %s962_s16 = sadd.s32 4294967294, %s1205_s14   ;;  %s1205_s14 = sphi %s1235_s14, %s15_s14   ;;  %s1201_s13 = sphi %s1233_s13, %s1408_s13   ;;  %s1197_s12 = sphi %s1231_s12, %s1407_s12   ;;  %s1193_s11 = sphi %s1229_s11, %s1406_s11   ;;  %s1189_s10 = sphi %s1227_s10, %s1405_s10   ;;  %s1185_s9 = sphi %s1225_s9, %s1404_s9  }
   0x5   : > { %s27_s17 = sadd.s32 1, %s1201_s13  ;;  %s85_s18 = sadd.s32 1, %s1193_s11 }
   0x6   : > { %p29_p0 = scmp.ge.s32.totalorder %s27_s17, 2  ;;  %p95_p1 = scmp.ne.s32.totalorder %s1193_s11, %s1189_s10 }
   0x7   : > { %p96_p2 = scmp.eq.s32.totalorder %s961_s15, 1  ;;  %p101_p3 = scmp.ne.s32.totalorder %s1189_s10, %s1185_s9 }
   0x8   : > { %s1410_s17 = smov (%p29_p0, %s27_s17), 0  ;;  %p102_p5 = scmp.eq.s32.totalorder %s962_s16, 1 }
   0x9   : > { %p1265_p4 = por %p96_p2, %p95_p1  ;;  %s80_s20 = ssub.s32 %s1201_s13, %s1410_s17 }
   0xa   : > { %p965_p6 = scmp.ge.s32.totalorder %s1205_s14, 1  ;;  %p83_p7 = scmp.eq.s32.totalorder %s80_s20, 0 }
   0xb   : > { %p1272_p8 = por %p102_p5, %p101_p3  ;;  %p134_p9 = scmp.lt.s32.totalorder %s1205_s14, 3 }
   0xc   : > { %s1278_s22 = scalar_select %p83_p7, %s1193_s11, %s85_s18  }
   0xd   : > { %p135_p10 = pnand %p965_p6, %p134_p9 }
   0xe   : > { %p159_p11 = scmp.lt.s32.totalorder (!%p135_p10), %s1197_s12, 1  ;;  %v204_v1 = vld [vmem:[%s1399_s0] sm:$0xff] (!%p135_p10)  ;;  %vm205_vm0 = vcmask (!%p135_p10), 261120   ;;  %v974_v7 = vld [vmem:[%s1399_s0 + $0x8] sm:$0xff] (!%p135_p10)  ;;  %v982_v8 = vld [vmem:[%s1399_s0 + $0x10] sm:$0xff] (!%p135_p10)  ;;  %vm290_vm1 = vcmask (!%p135_p10), 64512  }
   0xf   : > { %138 = sbr.rel (%p135_p10) target bundleno = 828 (0x33c), region = 28  ;;  %1029 = vmatprep.subr.msk.mxu0 (!%p135_p10), %vm205_vm0, %v204_v1  ;;  %1034 = vmatprep.subr.mxu1 (!%p135_p10), %v204_v1  ;;  %v990_v11 = vld [vmem:[%s1399_s0 + $0x18] sm:$0xff] (!%p135_p10)  ;;  %s156_s8 = sand.u32 (!%p135_p10), 1, %s1189_s10  }
  0x10   : > { %1030 = vmatpush3.xpose.msk.msra.mxu0 (!%p135_p10), %vm205_vm0, %v204_v1  ;;  %1035 = vmatpush3.msra.mxu1 (!%p135_p10), %v204_v1  ;;  %s966_s15 = sshll.u32 (!%p135_p10), %s156_s8, 6  ;;  %s1004_s18 = sshll.u32 (!%p135_p10), %s1197_s12, 10 }
  0x11   : > { %1039 = vmatprep.subr.msk.mxu1 (!%p135_p10), %vm205_vm0, %v974_v7  ;;  %1044 = vmatprep.subr.mxu0 (!%p135_p10), %v974_v7  ;;  %s1318_s16 = scalar_lea.vmem (!%p135_p10), [#allocation2], %s966_s15  ;;  %s1343_s25 = scalar_lea.hbm (!%p135_p10), %s1401_s2, %s1004_s18 }
  0x12   : > { %s882_s20 = sshll.u32 (!%p135_p10), %s1318_s16, 4  ;;  %s1345_s20 = int_to_ptr.vmem [resolvable:$true] %s882_s20 }
  0x13   : > { %s1127_s26 = scalar_lea.vmem (!%p135_p10), %s1345_s20, 1024 }
  0x14   : > { %p1128_p12 = scmp.ne.s32.totalorder (!%p135_p10), %s1345_s20, %s1127_s26 }
  0x16   : > { %s160_s23 = scalar_select %p159_p11, %s1197_s12, 1 }
  0x17   : > { %s1353_s12 = scalar_lea.sflag [#allocation3], %s156_s8  ;;  %p1129_p13 = pnand %p1128_p12, %p1265_p4 }
  0x18   : > { %s1003_s24 = sshll.u32 %s160_s23, 5 }
  0x19   : > { %s166_s27 = scalar_lea.vmem %s1400_s1, %s1003_s24  ;;  %p1130_p0 = pneg %p1129_p13 }
  0x1a   : > { %v168_v0 = vld [vmem:[%s166_s27] sm:$0xff]  ;;  %v169_v2 = vld [vmem:[%s166_s27 + $0x8] sm:$0xff]  ;;  %v170_v3 = vld [vmem:[%s166_s27 + $0x10] sm:$0xff] }
  0x1b   : > { %172 = vxpose.xlu0.b32.start [1/4] (short) (narrow) %v168_v0, 16  ;;  %v171_v4 = vld [vmem:[%s166_s27 + $0x18] sm:$0xff]  ;;  %s1207_s27 = smov [#allocation2]  }
  0x1c   : > { %s1131_s28 = sshll.u32 %s1207_s27, 4  ;;  %s1132_s28 = int_to_ptr.vmem [resolvable:$false] %s1131_s28 }
  0x1d   : > { %s1133_s29 = scalar_lea.vmem %s1132_s28, 2048  ;;  %p1134_p1 = scmp.lt.s32.totalorder %s1345_s20, %s1132_s28 }
  0x1e   : > { %p1135_p2 = scmp.lt.s32.totalorder %s1133_s29, %s1127_s26 }
  0x1f   : > { %173 = vxpose.xlu0.b32.cont [2/4] (short) (narrow) %v169_v2, 16 }
  0x20   : > { %p1136_p3 = por %p1135_p2, %p1134_p1 }
  0x22   : > { %p1137_p5 = pnand %p1136_p3, %p1130_p0 }
  0x23   : > { %174 = vxpose.xlu0.b32.cont [3/4] (short) (narrow) %v170_v3, 16 }
  0x27   : > { %175 = vxpose.xlu0.b32.end [4/4] (short) (narrow) %v171_v4, 16 }
  0x9b   : > { %v188_v5 = vpop.trf.xlu0 }
  0x9c   : > { %1031 = vmatprep.mubr.msk.f32.mxu0 %vm205_vm0, %v188_v5 }
  0x9f   : > { %v189_v6 = vpop.trf.xlu0 }
  0xa0   : > { %1032 = vmatmul.mubr.msk.f32.vlgmr.msra.gmra.mrb[0].mxu0 %vm205_vm0, %v189_v6 }
  0xa1   : > { %1045 = vmatpush3.msra.mxu0 %v974_v7 }
  0xa2   : > { %1054 = vmatprep.subr.mxu0 %v982_v8 }
 0x173   : > { %v1033_v9 = vpop.f32.mrb[0].mxu0 }
 0x174   : > { %v281_v10 = vpop.f32.mrb[1].mxu0 }
 0x175   : > { %1036 = vmatprep.mubr.msk.f32.mxu1 %vm290_vm1, %v281_v10 }
 0x176   : > { %1037 = vmatmul.mubr.msk.f32.vlgmr.msra.gmra.mrb[0].mxu1 %vm290_vm1, %v1033_v9 }
 0x177   : > { %1040 = vmatpush3.xpose.msk.msra.mxu1 %vm205_vm0, %v974_v7  ;;  %1041 = vmatprep.mubr.msk.f32.mxu1 %vm205_vm0, %v188_v5 }
 0x178   : > { %1049 = vmatprep.subr.msk.mxu1 %vm205_vm0, %v982_v8 }
 0x17a   : > { %1042 = vmatmul.mubr.msk.f32.vlgmr.msra.gmra.mrb[2].mxu1 %vm205_vm0, %v189_v6 }
 0x17b   : > { %1050 = vmatpush3.xpose.msk.msra.mxu1 %vm205_vm0, %v982_v8  ;;  %1051 = vmatprep.mubr.msk.f32.mxu1 %vm205_vm0, %v188_v5 }
 0x17c   : > { %1059 = vmatprep.subr.msk.mxu1 %vm205_vm0, %v990_v11 }
 0x17e   : > { %1052 = vmatmul.mubr.msk.f32.vlgmr.msra.gmra.mrb[4].mxu1 %vm205_vm0, %v189_v6 }
 0x17f   : > { %1060 = vmatpush3.xpose.msk.msra.mxu1 %vm205_vm0, %v990_v11  ;;  %1061 = vmatprep.mubr.msk.f32.mxu1 %vm205_vm0, %v188_v5 }
 0x182   : > { %1062 = vmatmul.mubr.msk.f32.vlgmr.msra.gmra.mrb[6].mxu1 %vm205_vm0, %v189_v6 }
 0x249   : > { %v1038_v12 = vpop.f32.mrb[0].mxu1 }
 0x24a   : > { %373 = vst.msk [vmem:[%s1318_s16 + $0x8] sm:$0xff] %vm205_vm0, %v1038_v12  ;;  %v363_v13 = vpop.f32.mrb[1].mxu1 }
 0x24b   : > { %372 = vst.msk [vmem:[%s1318_s16] sm:$0xff] %vm205_vm0, %v363_v13 }
 0x24d   : > { %v1043_v14 = vpop.f32.mrb[2].mxu1 }
 0x24e   : > { %v445_v15 = vpop.f32.mrb[3].mxu1 }
 0x24f   : > { %1046 = vmatprep.mubr.msk.f32.mxu0 %vm290_vm1, %v445_v15 }
 0x250   : > { %1047 = vmatmul.mubr.msk.f32.vlgmr.msra.gmra.mrb[2].mxu0 %vm290_vm1, %v1043_v14 }
 0x251   : > { %1055 = vmatpush3.msra.mxu0 %v982_v8  ;;  %v1053_v16 = vpop.f32.mrb[4].mxu1 }
 0x252   : > { %v609_v17 = vpop.f32.mrb[5].mxu1  ;;  %1064 = vmatprep.subr.mxu0 %v990_v11 }
 0x253   : > { %1056 = vmatprep.mubr.msk.f32.mxu0 %vm290_vm1, %v609_v17 }
 0x254   : > { %1057 = vmatmul.mubr.msk.f32.vlgmr.msra.gmra.mrb[4].mxu0 %vm290_vm1, %v1053_v16 }
 0x255   : > { %1065 = vmatpush3.msra.mxu0 %v990_v11  ;;  %v1063_v18 = vpop.f32.mrb[6].mxu1 }
 0x256   : > { %v773_v19 = vpop.f32.mrb[7].mxu1 }
 0x257   : > { %1066 = vmatprep.mubr.msk.f32.mxu0 %vm290_vm1, %v773_v19 }
 0x258   : > { %1067 = vmatmul.mubr.msk.f32.vlgmr.msra.gmra.mrb[6].mxu0 %vm290_vm1, %v1063_v18 }
 0x323   : > { %v1048_v20 = vpop.f32.mrb[2].mxu0 }
 0x324   : > { %981 = vst.msk [vmem:[%s1318_s16 + $0x18] sm:$0xff] %vm205_vm0, %v1048_v20  ;;  %v526_v21 = vpop.f32.mrb[3].mxu0 }
 0x325   : > { %980 = vst.msk [vmem:[%s1318_s16 + $0x10] sm:$0xff] %vm205_vm0, %v526_v21 }
 0x327   : > { %v1058_v22 = vpop.f32.mrb[4].mxu0 }
 0x328   : > { %989 = vst.msk [vmem:[%s1318_s16 + $0x28] sm:$0xff] %vm205_vm0, %v1058_v22  ;;  %v690_v23 = vpop.f32.mrb[5].mxu0 }
 0x329   : > { %988 = vst.msk [vmem:[%s1318_s16 + $0x20] sm:$0xff] %vm205_vm0, %v690_v23 }
 0x32b   : > { %v1068_v24 = vpop.f32.mrb[6].mxu0 }
 0x32c   : > { %997 = vst.msk [vmem:[%s1318_s16 + $0x38] sm:$0xff] %vm205_vm0, %v1068_v24  ;;  %v854_v25 = vpop.f32.mrb[7].mxu0 }
 0x32d   : > { %996 = vst.msk [vmem:[%s1318_s16 + $0x30] sm:$0xff] %vm205_vm0, %v854_v25 }
 0x32e   : > { %1140 = shalt.err (!%p1137_p5)
}
 0x32f   : > { %s1141_s30 = scalar_lea.hbm %s1343_s25, 1024  ;;  %s1145_s5 = scalar_lea.hbm %s1401_s2, 2048 }
 0x330   : > { %p1142_p6 = scmp.ne.s32.totalorder %s1343_s25, %s1141_s30  ;;  %p1146_p10 = scmp.lt.u32.totalorder %s1343_s25, %s1401_s2 }
 0x331   : > { %p1147_p11 = scmp.lt.u32.totalorder %s1145_s5, %s1141_s30  ;;  %p1149_p13 = scmp.lt.u32.totalorder %s1141_s30, %s1343_s25 }
 0x332   : > { %p1143_p7 = pnand %p1142_p6, %p1265_p4 }
 0x333   : > { %p1148_p12 = por %p1147_p11, %p1146_p10 }
 0x334   : > { %p1144_p9 = pneg %p1143_p7 }
 0x335   : > { %p1150_p0 = por %p1149_p13, %p1148_p12 }
 0x337   : > { %p1151_p1 = pnand %p1150_p0, %p1144_p9 }
 0x339   : > { %1154 = shalt.err (!%p1151_p1)
}
 0x33a   : > { %s1208_s8 = smov 128   ;;  %s1209_s15 = smov 8  }
 0x33b   : > { %1069 = dma.vmem_to_hbm [thread:$0]  (%p1265_p4), %s1345_s20, 1024, %s1343_s25, %s1353_s12, %s1208_s8, %s1208_s8, %s1209_s15  }
 0x33c PF: > { %p1075_p2 = scmp.ge.s32.totalorder %s1205_s14, 2  ;;  %s897_s16 = sand.u32 1, %s1185_s9  }
 0x33d   : > { %s898_s18 = scalar_lea.sflag [#allocation3], %s897_s16 }
 0x33e   : > { %p1072_p3 = pnand %p1075_p2, %p1272_p8 }
 0x340   : > { %1180 = dma.done.wait (!%p1072_p3), %s898_s18, 1024  }
 0x341   : > { %1182 = vsyncadd (!%p1072_p3), %s898_s18, 4294966272  ;;  %s15_s14 = sadd.s32 1, %s1205_s14   ;;  %s1404_s9 = smov %s1189_s10 }
 0x342   : > { %p12_p5 = scmp.ge.s32.totalorder %s15_s14, 4   ;;  %s1405_s10 = smov %s1193_s11 }
 0x343   : > { %s1406_s11 = smov %s1278_s22  ;;  %s1407_s12 = smov %s1201_s13 }
 0x344   : > { %s1408_s13 = smov %s1410_s17  ;;  %14 = sbr.rel (!%p12_p5) target bundleno = 4 (0x4), region = 69 }
 0x34b   :  { %903 = vsyncpa [#allocation3], 1 }
 0x34c   :  { %905 = vsyncpa [#allocation3 + $0x1], 1 }

</bundles_post_ra>
